<compile_context>
chip_gen: v5e
topology: v5e:2x2
jax: 0.10.0
libtpu: 0.0.40
codegen_flags: <defaults>
</compile_context>

<pallas_src>
import functools
import math

import jax
import jax.numpy as jnp
from jax.experimental import pallas as pl
from jax.experimental.pallas import tpu as pltpu

# PTransIPs defines d_k as a module-level global; kept for fidelity with the
# PyTorch spec (the kernel itself derives the scale from the actual head dim).
d_k = 32


def _sdpa_kernel(q_ref, k_ref, v_ref, mask_ref, ctx_ref, attn_ref, *, scale):
    # Each block is a batch of TBH (batch*head) slices:
    #   q/k/v -> (TBH, S, D), mask -> (TBH, S, S) int8 (1 == masked)
    q = q_ref[...] * scale          # fold 1/sqrt(d_k) into Q (S*D work, not S*S)
    k = k_ref[...]
    v = v_ref[...]
    m = mask_ref[...]

    # scores = (Q*scale) @ K^T — batched, transpose-free contraction on last dims.
    scores = jnp.einsum(
        "bqd,bkd->bqk", q, k, preferred_element_type=jnp.float32
    )
    # masked_fill_(attn_mask, -1e9)
    scores = jnp.where(m != 0, jnp.float32(-1e9), scores)

    # Numerically stable softmax over the last axis.
    mx = jnp.max(scores, axis=-1, keepdims=True)
    e = jnp.exp(scores - mx)
    denom = jnp.sum(e, axis=-1, keepdims=True)
    # approx=False keeps bit-level parity with the f32 reference; approx=True
    # would move the divide onto the EUP slot at ~1e-6 relative perturbation.
    attn = e * pl.reciprocal(denom, approx=False)

    # context = attn @ V  (batched MXU matmul, f32 accumulation)
    ctx = jnp.einsum(
        "bqk,bkd->bqd", attn.astype(v.dtype), v, preferred_element_type=jnp.float32
    )

    ctx_ref[...] = ctx.astype(ctx_ref.dtype)
    attn_ref[...] = attn.astype(attn_ref.dtype)


def _choose_tbh(BH, S, D, budget_bytes=16 * 1024 * 1024):
    """Largest heads-per-block that fits a conservative VMEM budget.

    Prefers BH // TBH >= 2 so the 'parallel' grid axis can still be sharded
    across v7x's two TensorCores.
    """
    # Double-buffered I/O blocks (q,k,v f32 + ctx f32 + mask i8 + attn f32)
    # plus in-kernel f32 scores/exp intermediates, per fused slice.
    per_unit = 2 * (4 * S * D * 4 + S * S * 1 + S * S * 4) + 2 * S * S * 4
    divisors = [t for t in range(1, BH + 1) if BH % t == 0]
    fitting = [t for t in divisors if t * per_unit <= budget_bytes] or [1]
    multi = [t for t in fitting if BH // t >= 2]
    return max(multi) if multi else max(fitting)


def scaled_dot_product_attention(Q, K, V, attn_mask):
    """Q, K, V: [B, H, S, D] float32; attn_mask: [B, H, S, S] bool/int (nonzero=mask)."""
    B, H, S, D = Q.shape
    BH = B * H
    scale = 1.0 / math.sqrt(D)   # use the actual head dim, not the global d_k

    q = Q.reshape(BH, S, D)
    k = K.reshape(BH, S, D)
    v = V.reshape(BH, S, D)
    mask = attn_mask.reshape(BH, S, S).astype(jnp.int8)   # 4x smaller than int32

    TBH = _choose_tbh(BH, S, D)
    grid = (BH // TBH,)

    kernel = functools.partial(_sdpa_kernel, scale=scale)

    ctx, attn = pl.pallas_call(
        kernel,
        out_shape=(
            jax.ShapeDtypeStruct((BH, S, D), Q.dtype),
            jax.ShapeDtypeStruct((BH, S, S), jnp.float32),
        ),
        grid_spec=pltpu.PrefetchScalarGridSpec(
            num_scalar_prefetch=0,
            grid=grid,
            in_specs=[
                pl.BlockSpec((TBH, S, D), lambda i: (i, 0, 0)),
                pl.BlockSpec((TBH, S, D), lambda i: (i, 0, 0)),
                pl.BlockSpec((TBH, S, D), lambda i: (i, 0, 0)),
                pl.BlockSpec((TBH, S, S), lambda i: (i, 0, 0)),
            ],
            out_specs=[
                pl.BlockSpec((TBH, S, D), lambda i: (i, 0, 0)),
                pl.BlockSpec((TBH, S, S), lambda i: (i, 0, 0)),
            ],
        ),
        compiler_params=pltpu.CompilerParams(
            dimension_semantics=("parallel",),
            vmem_limit_bytes=48 * 1024 * 1024,   # explicit budget (safe on v7x's 64 MiB)
        ),
    )(q, k, v, mask)

    return ctx.reshape(B, H, S, D), attn.reshape(B, H, S, S)


def _reference(Q, K, V, attn_mask):
    scores = jnp.einsum("bhqd,bhkd->bhqk", Q, K) / math.sqrt(Q.shape[-1])
    scores = jnp.where(attn_mask, -1e9, scores)
    attn = jax.nn.softmax(scores, axis=-1)
    ctx = jnp.einsum("bhqk,bhkd->bhqd", attn, V)
    return ctx, attn


if __name__ == "__main__":
    B, H, S, D = 2, 2, 8, d_k
    key = jax.random.PRNGKey(0)
    kq, kk, kv, km = jax.random.split(key, 4)
    Q = jax.random.normal(kq, (B, H, S, D), dtype=jnp.float32)
    K = jax.random.normal(kk, (B, H, S, D), dtype=jnp.float32)
    V = jax.random.normal(kv, (B, H, S, D), dtype=jnp.float32)
    # padding-style mask: mask out the last 2 key positions, broadcast to [B,H,S,S]
    key_pad = jnp.arange(S) >= (S - 2)                      # (S,)
    attn_mask = jnp.broadcast_to(key_pad[None, None, None, :], (B, H, S, S))

    ctx, attn = scaled_dot_product_attention(Q, K, V, attn_mask)
    jax.block_until_ready((ctx, attn))

    ctx_ref, attn_ref = _reference(Q, K, V, attn_mask)
    assert jnp.allclose(ctx, ctx_ref, atol=1e-5, rtol=1e-5)
    assert jnp.allclose(attn, attn_ref, atol=1e-5, rtol=1e-5)
    print("KERNEL_OK")
</pallas_src>

<mosaic_0001>
module attributes {stable_mosaic.version = 11 : i64} {
  func.func @_sdpa_kernel(%arg0: i32, %arg1: memref<2x8x32xf32, #tpu.memory_space<vmem>>, %arg2: memref<2x8x32xf32, #tpu.memory_space<vmem>>, %arg3: memref<2x8x32xf32, #tpu.memory_space<vmem>>, %arg4: memref<2x8x8xi8, #tpu.memory_space<vmem>>, %arg5: memref<2x8x32xf32, #tpu.memory_space<vmem>>, %arg6: memref<2x8x8xf32, #tpu.memory_space<vmem>>) attributes {dimension_semantics = [#tpu.dimension_semantics<parallel>], iteration_bounds = array<i64: 2>, scalar_prefetch = 0 : i64, scratch_operands = 0 : i64, tpu.core_type = #tpu.core_type<tc>, window_params = [{transform_indices = @transform_0, window_bounds = array<i64: 2, 8, 32>}, {transform_indices = @transform_1, window_bounds = array<i64: 2, 8, 32>}, {transform_indices = @transform_2, window_bounds = array<i64: 2, 8, 32>}, {transform_indices = @transform_3, window_bounds = array<i64: 2, 8, 8>}, {transform_indices = @transform_4, window_bounds = array<i64: 2, 8, 32>}, {transform_indices = @transform_5, window_bounds = array<i64: 2, 8, 8>}]} {
    %c0 = arith.constant 0 : index
    %c0_0 = arith.constant 0 : index
    %c0_1 = arith.constant 0 : index
    %0 = vector.load %arg1[%c0, %c0_0, %c0_1] : memref<2x8x32xf32, #tpu.memory_space<vmem>>, vector<2x8x32xf32>
    %cst = arith.constant 0.176776692 : f32
    %1 = vector.broadcast %cst : f32 to vector<2x8x32xf32>
    %2 = arith.mulf %0, %1 : vector<2x8x32xf32>
    %c0_2 = arith.constant 0 : index
    %c0_3 = arith.constant 0 : index
    %c0_4 = arith.constant 0 : index
    %3 = vector.load %arg2[%c0_2, %c0_3, %c0_4] : memref<2x8x32xf32, #tpu.memory_space<vmem>>, vector<2x8x32xf32>
    %c0_5 = arith.constant 0 : index
    %c0_6 = arith.constant 0 : index
    %c0_7 = arith.constant 0 : index
    %4 = vector.load %arg3[%c0_5, %c0_6, %c0_7] : memref<2x8x32xf32, #tpu.memory_space<vmem>>, vector<2x8x32xf32>
    %c0_8 = arith.constant 0 : index
    %c0_9 = arith.constant 0 : index
    %c0_10 = arith.constant 0 : index
    %5 = vector.load %arg4[%c0_8, %c0_9, %c0_10] : memref<2x8x8xi8, #tpu.memory_space<vmem>>, vector<2x8x8xi8>
    "tpu.trace_start"() <{level = 10 : i32, message = "bqd,bkd->bqk"}> : () -> ()
    %cst_11 = arith.constant dense<0.000000e+00> : vector<2x8x8xf32>
    %6 = tpu.matmul %2, %3, %cst_11 {dimension_numbers = #tpu.dot_dimension_numbers<[2], [2], [1], [1], [0, 0, 0, 1, 1, 1], [0], [0]>} : vector<2x8x32xf32>, vector<2x8x32xf32>, vector<2x8x8xf32> -> vector<2x8x8xf32>
    %c0_i8 = arith.constant 0 : i8
    "tpu.trace_stop"() : () -> ()
    %7 = vector.broadcast %c0_i8 : i8 to vector<2x8x8xi8>
    %8 = arith.cmpi ne, %5, %7 : vector<2x8x8xi8>
    %cst_12 = arith.constant -1.000000e+09 : f32
    %9 = vector.broadcast %cst_12 : f32 to vector<2x8x8xf32>
    %10 = arith.select %8, %9, %6 : vector<2x8x8xi1>, vector<2x8x8xf32>
    %cst_13 = arith.constant dense<0xFF800000> : vector<2x8xf32>
    %11 = vector.multi_reduction <maximumf>, %10, %cst_13 [2] : vector<2x8x8xf32> to vector<2x8xf32>
    %12 = vector.shape_cast %11 : vector<2x8xf32> to vector<2x8x1xf32>
    %13 = vector.broadcast %12 : vector<2x8x1xf32> to vector<2x8x8xf32>
    %14 = arith.subf %10, %13 : vector<2x8x8xf32>
    %15 = math.exp %14 : vector<2x8x8xf32>
    %cst_14 = arith.constant dense<0.000000e+00> : vector<2x8xf32>
    %16 = vector.multi_reduction <add>, %15, %cst_14 [2] : vector<2x8x8xf32> to vector<2x8xf32>
    %17 = vector.shape_cast %16 : vector<2x8xf32> to vector<2x8x1xf32>
    %18 = tpu.reciprocal %17 : vector<2x8x1xf32> -> vector<2x8x1xf32>
    %19 = vector.broadcast %18 : vector<2x8x1xf32> to vector<2x8x8xf32>
    %20 = arith.mulf %15, %19 : vector<2x8x8xf32>
    "tpu.trace_start"() <{level = 10 : i32, message = "bqk,bkd->bqd"}> : () -> ()
    %cst_15 = arith.constant dense<0.000000e+00> : vector<2x8x32xf32>
    %21 = tpu.matmul %20, %4, %cst_15 {dimension_numbers = #tpu.dot_dimension_numbers<[2], [1], [1], [2], [0, 0, 0, 1, 1, 2], [0], [0]>} : vector<2x8x8xf32>, vector<2x8x32xf32>, vector<2x8x32xf32> -> vector<2x8x32xf32>
    "tpu.trace_stop"() : () -> ()
    %c0_16 = arith.constant 0 : index
    %c0_17 = arith.constant 0 : index
    %c0_18 = arith.constant 0 : index
    %22 = vector.load %arg5[%c0_16, %c0_17, %c0_18] : memref<2x8x32xf32, #tpu.memory_space<vmem>>, vector<2x8x32xf32>
    tpu.vector_store %arg5[%c0_16, %c0_17, %c0_18], %21 {strides = array<i32>} : memref<2x8x32xf32, #tpu.memory_space<vmem>>, vector<2x8x32xf32>,
    %c0_19 = arith.constant 0 : index
    %c0_20 = arith.constant 0 : index
    %c0_21 = arith.constant 0 : index
    %23 = vector.load %arg6[%c0_19, %c0_20, %c0_21] : memref<2x8x8xf32, #tpu.memory_space<vmem>>, vector<2x8x8xf32>
    tpu.vector_store %arg6[%c0_19, %c0_20, %c0_21], %20 {strides = array<i32>} : memref<2x8x8xf32, #tpu.memory_space<vmem>>, vector<2x8x8xf32>,
    return
  }
  func.func @transform_0(%arg0: i32) -> (i32, i32, i32) {
    %c0_i32 = arith.constant 0 : i32
    %c0_i32_0 = arith.constant 0 : i32
    %c0_i32_1 = arith.constant 0 : i32
    return %arg0, %c0_i32, %c0_i32_0 : i32, i32, i32
  }
  func.func @transform_1(%arg0: i32) -> (i32, i32, i32) {
    %c0_i32 = arith.constant 0 : i32
    %c0_i32_0 = arith.constant 0 : i32
    %c0_i32_1 = arith.constant 0 : i32
    return %arg0, %c0_i32, %c0_i32_0 : i32, i32, i32
  }
  func.func @transform_2(%arg0: i32) -> (i32, i32, i32) {
    %c0_i32 = arith.constant 0 : i32
    %c0_i32_0 = arith.constant 0 : i32
    %c0_i32_1 = arith.constant 0 : i32
    return %arg0, %c0_i32, %c0_i32_0 : i32, i32, i32
  }
  func.func @transform_3(%arg0: i32) -> (i32, i32, i32) {
    %c0_i32 = arith.constant 0 : i32
    %c0_i32_0 = arith.constant 0 : i32
    %c0_i32_1 = arith.constant 0 : i32
    return %arg0, %c0_i32, %c0_i32_0 : i32, i32, i32
  }
  func.func @transform_4(%arg0: i32) -> (i32, i32, i32) {
    %c0_i32 = arith.constant 0 : i32
    %c0_i32_0 = arith.constant 0 : i32
    %c0_i32_1 = arith.constant 0 : i32
    return %arg0, %c0_i32, %c0_i32_0 : i32, i32, i32
  }
  func.func @transform_5(%arg0: i32) -> (i32, i32, i32) {
    %c0_i32 = arith.constant 0 : i32
    %c0_i32_0 = arith.constant 0 : i32
    %c0_i32_1 = arith.constant 0 : i32
    return %arg0, %c0_i32, %c0_i32_0 : i32, i32, i32
  }
}

</mosaic_0001>

<bundles_post_ra>
// kernel: tpu_custom_call.1
= control target key start
LH: loop header
LB: loop body
LE: loop exit
PB: predicated region body
PF: predicated region fallthrough
CT: control target
= control target key end

     0   :  { %s1414_s0 = inlined_call_operand.hbm [shape: f32[4,8,32], index: 0, kind: input, shape index: {}]   ;;  %s1415_s1 = inlined_call_operand.hbm [shape: f32[4,8,32], index: 1, kind: input, shape index: {}]   ;;  %s1416_s2 = inlined_call_operand.hbm [shape: f32[4,8,32], index: 2, kind: input, shape index: {}]   ;;  %s1417_s3 = inlined_call_operand.hbm [shape: s8[4,8,8], index: 3, kind: input, shape index: {}]   ;;  %s1418_s4 = inlined_call_operand.hbm [shape: f32[4,8,32], index: 4, kind: output, shape index: {0}]   ;;  %s1419_s5 = inlined_call_operand.hbm [shape: f32[4,8,8], index: 5, kind: output, shape index: {1}]  }
   0x1   :  { %1426 = sst [smem:[#allocation22_spill]] %s1414_s0 }
   0x2   :  { %1427 = sst [smem:[#allocation23_spill]] %s1415_s1 }
   0x3   :  { %11 = vsyncpa [#allocation3], 0 }
   0x4   :  { %13 = vsyncpa [#allocation3 + $0x1], 0 }
   0x5   :  { %14 = vsyncpa [#allocation6], 0 }
   0x6   :  { %16 = vsyncpa [#allocation6 + $0x1], 0 }
   0x7   :  { %17 = vsyncpa [#allocation9], 0 }
   0x8   :  { %19 = vsyncpa [#allocation9 + $0x1], 0 }
   0x9   :  { %20 = vsyncpa [#allocation4], 0 }
   0xa   :  { %22 = vsyncpa [#allocation4 + $0x1], 0 }
   0xb   :  { %23 = vsyncpa [#allocation12], 0 }
   0xc   :  { %25 = vsyncpa [#allocation12 + $0x1], 0  ;;  %s1157_s18 = smov 0   ;;  %s1159_s19 = smov 0  }
   0xd   :  { %s1161_s20 = smov 0   ;;  %s1163_s21 = smov 0  }
   0xe LB: > { %1428 = sst [smem:[#allocation18_spill]] %s1114_s20  ;;  %s1178_s22 = sadd.s32 4294967295, %s1118_s21   ;;  %s1118_s21 = sphi %s1163_s21, %s1441_s21   ;;  %s1114_s20 = sphi %s1161_s20, %s1443_s20   ;;  %s1110_s19 = sphi %s1159_s19, %s1445_s19   ;;  %s1106_s18 = sphi %s1157_s18, %s1444_s18  }
   0xf   : > { %s769_s23 = sadd.s32 4294967294, %s1118_s21   ;;  %s1182_s24 = sadd.s32 1, %s1118_s21  }
  0x10   : > { %1429 = sst [smem:[#allocation19_spill]] %s1182_s24  ;;  %s38_s25 = sadd.s32 1, %s1114_s20 }
  0x11   : > { %s35_s26 = ssub.s32 %s1118_s21, %s1182_s24  ;;  %p45_p0 = scmp.ne.s32.totalorder %s1114_s20, %s1110_s19 }
  0x12   : > { %p36_p1 = scmp.eq.s32.totalorder %s35_s26, 0  ;;  %p46_p2 = scmp.eq.s32.totalorder %s1118_s21, 0 }
  0x13   : > { %p51_p3 = scmp.ne.s32.totalorder %s1110_s19, %s1106_s18  ;;  %p52_p4 = scmp.eq.s32.totalorder %s1178_s22, 0 }
  0x14   : > { %s1194_s27 = scalar_select %p36_p1, %s1114_s20, %s38_s25  }
  0x15   : > { %p47_p5 = por %p46_p2, %p45_p0  ;;  %p1196_p6 = por %p52_p4, %p51_p3 }
  0x16   : > { %1430 = sst [smem:[#allocation20_spill]] %s1194_s27  ;;  %p153_p7 = scmp.eq.s32.totalorder %s1178_s22, 1 }
  0x17   : > { %p159_p8 = scmp.eq.s32.totalorder %s769_s23, 1  ;;  %p771_p9 = scmp.ge.s32.totalorder %s1118_s21, 2 }
  0x18   : > { %p843_p10 = scmp.lt.s32.totalorder %s1118_s21, 2  ;;  %p1203_p11 = por %p153_p7, %p45_p0 }
  0x19   : > { %p1207_p12 = por %p159_p8, %p51_p3  ;;  %s1212_s6 = sand.u32 1, %s1114_s20  }
  0x1a   : > { %s1215_s7 = sshll.u32 %s1118_s21, 4  ;;  %s1218_s8 = sshll.u32 %s1212_s6, 4 }
  0x1b   : > { %s1433_s30 = scalar_select %p1207_p12, 1, 0 }
  0x1c   : > { %p1220_p13 = pnand %p843_p10, %p47_p5  ;;  %s227_s10 = sand.u32 1, %s1118_s21  }
  0x1d   : > { %1434 = sst [smem:[#allocation21_spill]] %s1433_s30  ;;  %s231_s14 = scalar_lea.vmem [#allocation5], %s1218_s8 }
  0x1e   : > { %s1436_s1 = sld [smem:[#allocation23_spill]]  ;;  %s239_s15 = sshll.u32 %s231_s14, 4  ;;  %s240_s15 = int_to_ptr.vmem [resolvable:$true] %s239_s15 }
  0x1f   : > { %p784_p0 = scmp.ge.s32.totalorder %s1118_s21, 1  ;;  %s1231_s17 = scalar_lea.sflag [#allocation6], %s227_s10 }
  0x20   : > { %p896_p2 = pneg %p1220_p13 }
  0x24   : > { %s236_s13 = scalar_lea.hbm %s1436_s1, %s1215_s7  ;;  %s899_s12 = scalar_lea.hbm %s1436_s1, 32 }
  0x25   : > { %s237_s16 = sshll.u32 %s236_s13, 4  ;;  %s238_s16 = int_to_ptr.hbm [resolvable:$true] %s237_s16 }
  0x26   : > { %s892_s23 = sshra.s32 %s238_s16, 4  ;;  %s893_s23 = int_to_ptr.hbm [resolvable:$true] %s892_s23 }
  0x27   : > { %s894_s25 = scalar_lea.hbm %s893_s23, 16  ;;  %p900_p5 = scmp.lt.s32.totalorder %s893_s23, %s1436_s1 }
  0x28   : > { %p895_p1 = scmp.ne.s32.totalorder %s893_s23, %s894_s25  ;;  %p901_p7 = scmp.lt.s32.totalorder %s899_s12, %s894_s25 }
  0x2a   : > { %p897_p3 = pnand %p896_p2, %p895_p1  ;;  %p902_p8 = por %p901_p7, %p900_p5 }
  0x2c   : > { %p898_p4 = pneg %p897_p3 }
  0x2e   : > { %p903_p10 = pnand %p902_p8, %p898_p4 }
  0x30   : > { %906 = shalt.err (!%p903_p10)
}
  0x31   : > { %s1423_s10 = smov 128   ;;  %s1121_s27 = smov 8  }
  0x32   : > { %829 = dma.hbm_to_vmem [thread:$0]  (!%p1220_p13), %s238_s16, 256, %s240_s15, %s1231_s17, %s1423_s10, %s1423_s10, %s1121_s27  }
  0x33   : > { %p291_p1 = scmp.lt.s32.totalorder %s1118_s21, 3  ;;  %s1437_s0 = sld [smem:[#allocation22_spill]] }
  0x34   : > { %s209_s13 = scalar_lea.vmem [#allocation2], %s1218_s8  ;;  %s206_s1 = scalar_lea.sflag [#allocation3], %s1212_s6 }
  0x35   : > { %p1257_p3 = pnand %p784_p0, %p291_p1  ;;  %s217_s14 = sshll.u32 %s209_s13, 4  ;;  %s218_s14 = int_to_ptr.vmem [resolvable:$true] %s217_s14 }
  0x39   : > { %s214_s26 = scalar_lea.hbm %s1437_s0, %s1215_s7  ;;  %s929_s23 = scalar_lea.hbm %s1437_s0, 32 }
  0x3a   : > { %s215_s12 = sshll.u32 %s214_s26, 4  ;;  %s216_s12 = int_to_ptr.hbm [resolvable:$true] %s215_s12 }
  0x3b   : > { %s922_s20 = sshra.s32 %s216_s12, 4  ;;  %s923_s20 = int_to_ptr.hbm [resolvable:$true] %s922_s20 }
  0x3c   : > { %s924_s24 = scalar_lea.hbm %s923_s20, 16  ;;  %p930_p0 = scmp.lt.s32.totalorder %s923_s20, %s1437_s0 }
  0x3d   : > { %p925_p4 = scmp.ne.s32.totalorder %s923_s20, %s924_s24  ;;  %p931_p8 = scmp.lt.s32.totalorder %s929_s23, %s924_s24 }
  0x3f   : > { %p927_p5 = pnand %p925_p4, %p896_p2  ;;  %p932_p10 = por %p931_p8, %p930_p0 }
  0x41   : > { %p928_p7 = pneg %p927_p5 }
  0x43   : > { %p933_p1 = pnand %p932_p10, %p928_p7 }
  0x45   : > { %936 = shalt.err (!%p933_p1)
}
  0x46   : > { %s1439_s26 = smov 128   ;;  %s258_s16 = scalar_lea.hbm %s1416_s2, %s1215_s7 }
  0x47   : > { %826 = dma.hbm_to_vmem [thread:$0]  (!%p1220_p13), %s216_s12, 256, %s218_s14, %s206_s1, %s1439_s26, %s1439_s26, %s1121_s27  }
  0x48   : > { %s253_s30 = scalar_lea.vmem [#allocation7], %s1218_s8  ;;  %s259_s20 = sshll.u32 %s258_s16, 4  ;;  %s260_s20 = int_to_ptr.hbm [resolvable:$true] %s259_s20 }
  0x49   : > { %s261_s10 = sshll.u32 %s253_s30, 4  ;;  %s952_s24 = sshra.s32 %s260_s20, 4  ;;  %s262_s10 = int_to_ptr.vmem [resolvable:$true] %s261_s10  ;;  %s953_s24 = int_to_ptr.hbm [resolvable:$true] %s952_s24 }
  0x4a   : > { %s954_s23 = scalar_lea.hbm %s953_s24, 16  ;;  %s959_s1 = scalar_lea.hbm %s1416_s2, 32 }
  0x4b   : > { %p955_p4 = scmp.ne.s32.totalorder %s953_s24, %s954_s23  ;;  %p960_p0 = scmp.lt.s32.totalorder %s953_s24, %s1416_s2 }
  0x4c   : > { %p961_p8 = scmp.lt.s32.totalorder %s959_s1, %s954_s23 }
  0x4d   : > { %p957_p5 = pnand %p955_p4, %p896_p2 }
  0x4e   : > { %p962_p10 = por %p961_p8, %p960_p0 }
  0x4f   : > { %p958_p7 = pneg %p957_p5 }
  0x51   : > { %p963_p1 = pnand %p962_p10, %p958_p7 }
  0x53   : > { %966 = shalt.err (!%p963_p1)
}
  0x54   : > { %832 = dma.hbm_to_vmem [thread:$0]  (!%p1220_p13), %s260_s20, 256, %s262_s10, %s1231_s17, %s1439_s26, %s1439_s26, %s1121_s27  }
  0x55   : > { %s781_s0 = sshll.u32 %s1212_s6, 2  ;;  %s808_s30 = sshll.u32 %s1118_s21, 2 }
  0x56   : > { %s280_s13 = scalar_lea.hbm %s1417_s3, %s808_s30  ;;  %s275_s16 = scalar_lea.vmem [#allocation8], %s781_s0 }
  0x57   : > { %s281_s15 = sshll.u32 %s280_s13, 4  ;;  %s283_s24 = sshll.u32 %s275_s16, 4  ;;  %s282_s15 = int_to_ptr.hbm [resolvable:$true] %s281_s15  ;;  %s284_s24 = int_to_ptr.vmem [resolvable:$true] %s283_s24 }
  0x58   : > { %s272_s23 = scalar_lea.sflag [#allocation9], %s1212_s6  ;;  %s982_s25 = sshra.s32 %s282_s15, 4  ;;  %s983_s25 = int_to_ptr.hbm [resolvable:$true] %s982_s25 }
  0x59   : > { %s984_s1 = scalar_lea.hbm %s983_s25, 4  ;;  %s989_s26 = scalar_lea.hbm %s1417_s3, 8 }
  0x5a   : > { %p985_p4 = scmp.ne.s32.totalorder %s983_s25, %s984_s1  ;;  %p990_p0 = scmp.lt.s32.totalorder %s983_s25, %s1417_s3 }
  0x5b   : > { %p991_p8 = scmp.lt.s32.totalorder %s989_s26, %s984_s1 }
  0x5c   : > { %p987_p5 = pnand %p985_p4, %p896_p2 }
  0x5d   : > { %p992_p10 = por %p991_p8, %p990_p0 }
  0x5e   : > { %p988_p7 = pneg %p987_p5 }
  0x60   : > { %p993_p1 = pnand %p992_p10, %p988_p7 }
  0x62   : > { %996 = shalt.err (!%p993_p1)
}
  0x63   : > { %s1122_s6 = smov 32   ;;  %s1123_s12 = smov 2  }
  0x64   : > { %835 = dma.hbm_to_vmem [thread:$0]  (!%p1220_p13), %s282_s15, 64, %s284_s24, %s272_s23, %s1122_s6, %s1122_s6, %s1123_s12  }
  0x65   : > { %295 = sbr.rel (%p1257_p3) target bundleno = 651 (0x28b), region = 36  ;;  %s1317_s14 = sand.u32 (!%p1257_p3), 1, %s1110_s19  }
  0x66   : > { %s1320_s0 = sshll.u32 (!%p1257_p3), %s1317_s14, 4  ;;  %s298_s30 = scalar_lea.sflag (!%p1257_p3), [#allocation3], %s1317_s14 }
  0x67   : > { %s301_s7 = scalar_lea.vmem (!%p1257_p3), [#allocation2], %s1320_s0 }
  0x6a   : > { %1085 = dma.done.wait (%p1196_p6), %s298_s30, 256  }
  0x6b   : > { %1087 = vsyncadd (%p1196_p6), %s298_s30, 4294967040  ;;  %s307_s9 = sand.u32 1, %s1178_s22   ;;  %s311_s8 = scalar_lea.vmem [#allocation5], %s1320_s0 }
  0x6c   : > { %s308_s11 = scalar_lea.sflag [#allocation6], %s307_s9 }
  0x6d   : > { %1089 = dma.done.wait (%p1196_p6), %s308_s11, 512  }
  0x6e   : > { %1091 = vsyncadd (%p1196_p6), %s308_s11, 4294966784  ;;  %s788_s13 = sshll.u32 %s1317_s14, 2  ;;  %s321_s15 = scalar_lea.vmem [#allocation7], %s1320_s0 }
  0x6f   : > { %s328_s16 = scalar_lea.sflag [#allocation9], %s1317_s14  ;;  %s331_s24 = scalar_lea.vmem [#allocation8], %s788_s13 }
  0x70   : > { %1093 = dma.done.wait (%p1196_p6), %s328_s16, 64  }
  0x71   : > { %1095 = vsyncadd (%p1196_p6), %s328_s16, 4294967232  ;;  %vm397_vm0 = vcmask 261120   ;;  %v391_v0 = vld [vmem:[%s311_s8] sm:$0xff]  ;;  %v392_v2 = vld [vmem:[%s311_s8 + $0x8] sm:$0xff]  ;;  %v1124_v8 = vmov 0   ;;  %vm460_vm4 = vcmask 64512  }
  0x72   : > { %v387_v1 = vld [vmem:[%s301_s7] sm:$0xff]  ;;  %791 = vmatpush.xpose.msk.msra.mxu0 %vm397_vm0, %v391_v0  ;;  %793 = vmatpush.xpose.msk.msra.mxu1 %vm397_vm0, %v392_v2  ;;  %v388_v4 = vld [vmem:[%s301_s7 + $0x8] sm:$0xff]  ;;  %s378_s28 = scalar_lea.vmem [#allocation11], %s1320_s0  ;;  %s809_s23 = sshll.u32 %s1178_s22, 4 }
  0x73   : > { %v389_v3 = vmul.f32 0.17677669, %v387_v1  ;;  %v390_v5 = vmul.f32 0.17677669, %v388_v4  ;;  %v395_v6 = vld [vmem:[%s331_s24] sm:$0x3]  ;;  %s593_s17 = scalar_lea.hbm %s1419_s5, %s809_s23 }
  0x74   : > { %vm450_vm1 = vnez %v395_v6  ;;  %v396_v7 = vld [vmem:[%s331_s24 + $0x2] sm:$0x3]  ;;  %v394_v30 = vld [vmem:[%s321_s15 + $0x8] sm:$0xff]  ;;  %s594_s25 = sshll.u32 %s378_s28, 4  ;;  %s596_s26 = sshll.u32 %s593_s17, 4  ;;  %s595_s25 = int_to_ptr.vmem [resolvable:$true] %s594_s25  ;;  %s597_s26 = int_to_ptr.hbm [resolvable:$true] %s596_s26 }
  0x75   : > { %792 = vmatmul.msk.f32.vlgmr.msra.gmra.mxu0 %vm397_vm0, %v389_v3  ;;  %794 = vmatmul.msk.f32.vlgmr.msra.gmra.mxu1 %vm397_vm0, %v390_v5  ;;  %v452_v9 = vsel %vm450_vm1, 16843009, %v1124_v8  ;;  %vm451_vm2 = vnez %v396_v7  ;;  %v393_v29 = vld [vmem:[%s321_s15] sm:$0xff]  ;;  %s565_s10 = scalar_lea.sflag [#allocation12], %s1317_s14  ;;  %s1026_s20 = sshra.s32 %s597_s26, 4  ;;  %s1027_s20 = int_to_ptr.hbm [resolvable:$true] %s1026_s20 }
  0x76   : > { %v454_v10 = vunpack.c.0.s8 %v452_v9  ;;  %v453_v11 = vsel %vm451_vm2, 16843009, %v1124_v8  ;;  %527 = vmatpush.msra.mxu2 %v393_v29  ;;  %550 = vmatpush.msra.mxu3 %v394_v30  ;;  %s1028_s6 = scalar_lea.hbm %s1027_s20, 16  ;;  %s1032_s22 = scalar_lea.hbm %s1419_s5, 32 }
  0x77   : > { %v455_v12 = vunpack.c.0.s8 %v453_v11  ;;  %p1029_p6 = scmp.ne.s32.totalorder %s1027_s20, %s1028_s6  ;;  %p1033_p3 = scmp.lt.s32.totalorder %s1027_s20, %s1419_s5 }
  0x78   : > { %vm456_vm3 = vcmp.ne.s32.totalorder %v454_v10, 0  ;;  %p1034_p4 = scmp.lt.s32.totalorder %s1032_s22, %s1028_s6 }
  0x79   : > { %vm457_vm5 = vcmp.ne.s32.totalorder %v455_v12, 0  ;;  %p1030_p13 = pnand %p1029_p6, %p1203_p11 }
  0x7a   : > { %p1035_p5 = por %p1034_p4, %p1033_p3 }
  0x7b   : > { %p1031_p2 = pneg %p1030_p13 }
  0x7d   : > { %p1036_p7 = pnand %p1035_p5, %p1031_p2 }
  0xf2   : > { %v421_v13 = vpop.f32.mrf.mxu0  ;;  %v447_v16 = vpop.f32.mrf.mxu1 }
  0xf3   : > { %v458_v14 = vsel %vm456_vm3, -1e+09, %v421_v13  ;;  %v459_v17 = vsel %vm457_vm5, -1e+09, %v447_v16 }
  0xf4   : > { %v461_v15 = vsel %vm460_vm4, %v458_v14, -inf  ;;  %v464_v18 = vsel %vm460_vm4, %v459_v17, -inf }
  0xf5   : > { %462 = vmax.xlane.f32.xlu0 %v461_v15 }
  0xfd   : > { %465 = vmax.xlane.f32.xlu0 %v464_v18 }
 0x168   : > { %v463_v19 = vpop.xlane.xlu0 %462 }
 0x169   : > { %v467_v20 = vsub.f32 %v458_v14, %v463_v19 }
 0x16b   : > { %v469_v21 = vmul.f32 1.442695, %v467_v20 }
 0x16d   : > { %884 = vpow2.f32 %v469_v21 }
 0x170   : > { %v466_v22 = vpop.xlane.xlu0 %465 }
 0x171   : > { %v468_v23 = vsub.f32 %v459_v17, %v466_v22 }
 0x173   : > { %v885_v24 = vpop.eup %884  ;;  %v471_v25 = vmul.f32 1.442695, %v468_v23 }
 0x174   : > { %v473_v26 = vsel %vm460_vm4, %v885_v24, 0.0 }
 0x175   : > { %886 = vpow2.f32 %v471_v25  ;;  %474 = vadd.xlane.f32.xlu1 %v473_v26 }
 0x17b   : > { %v887_v27 = vpop.eup %886 }
 0x17c   : > { %v476_v28 = vsel %vm460_vm4, %v887_v27, 0.0 }
 0x17d   : > { %477 = vadd.xlane.f32.xlu1 %v476_v28 }
 0x1e8   : > { %v475_v31 = vpop.xlane.xlu1 %474 }
 0x1e9   : > { %888 = vrcp.f32 %v475_v31  ;;  %v490_v36 = vand.u32 2147483648, %v475_v31  ;;  %v488_v38 = vand.u32 2147483647, %v475_v31  ;;  %vm484_vm7 = vweird.f32 %v475_v31 }
 0x1eb   : > { %v491_v41 = vor.u32 1.1754944e-38, %v490_v36  ;;  %vm489_vm9 = vcmp.eq.f32.partialorder %v488_v38, 8.507059e+37 }
 0x1ef   : > { %v889_v32 = vpop.eup %888 }
 0x1f0   : > { %v480_v33 = vmul.f32 %v889_v32, %v475_v31  ;;  %v478_v34 = vpop.xlane.xlu1 %477  ;;  %vm485_vm6 = vweird.f32 %v889_v32 }
 0x1f1   : > { %890 = vrcp.f32 %v478_v34  ;;  %vm486_vm8 = vmor %vm484_vm7, %vm485_vm6  ;;  %v504_v47 = vand.u32 2147483648, %v478_v34  ;;  %v502_v49 = vand.u32 2147483647, %v478_v34  ;;  %vm498_vm11 = vweird.f32 %v478_v34 }
 0x1f2   : > { %v481_v35 = vsub.f32 1.0, %v480_v33 }
 0x1f3   : > { %v505_v51 = vor.u32 1.1754944e-38, %v504_v47  ;;  %vm503_vm13 = vcmp.eq.f32.partialorder %v502_v49, 8.507059e+37 }
 0x1f4   : > { %v482_v37 = vmul.f32 %v889_v32, %v481_v35 }
 0x1f6   : > { %v483_v39 = vadd.f32 %v889_v32, %v482_v37 }
 0x1f7   : > { %v891_v40 = vpop.eup %890 }
 0x1f8   : > { %v494_v42 = vmul.f32 %v891_v40, %v478_v34  ;;  %v487_v43 = vsel %vm486_vm8, %v889_v32, %v483_v39  ;;  %vm499_vm10 = vweird.f32 %v891_v40 }
 0x1f9   : > { %v492_v44 = vsel %vm489_vm9, %v491_v41, %v487_v43  ;;  %vm500_vm12 = vmor %vm498_vm11, %vm499_vm10 }
 0x1fa   : > { %v495_v45 = vsub.f32 1.0, %v494_v42  ;;  %v507_v46 = vmul.f32 %v885_v24, %v492_v44 }
 0x1fc   : > { %v496_v48 = vmul.f32 %v891_v40, %v495_v45  ;;  %795 = vmatmul.msk.f32.vlgmr.msra.gmra.mxu2 %vm460_vm4, %v507_v46  ;;  %557 = vst.msk [vmem:[%s378_s28] sm:$0xff] %vm460_vm4, %v507_v46 }
 0x1fe   : > { %v497_v50 = vadd.f32 %v891_v40, %v496_v48 }
 0x200   : > { %v501_v52 = vsel %vm500_vm12, %v891_v40, %v497_v50 }
 0x201   : > { %v506_v53 = vsel %vm503_vm13, %v505_v51, %v501_v52 }
 0x202   : > { %v508_v54 = vmul.f32 %v887_v27, %v506_v53 }
 0x204   : > { %796 = vmatmul.msk.f32.vlgmr.msra.gmra.mxu3 %vm460_vm4, %v508_v54  ;;  %558 = vst.msk [vmem:[%s378_s28 + $0x8] sm:$0xff] %vm460_vm4, %v508_v54 }
 0x205   : > { %1039 = shalt.err (!%p1036_p7)
}
 0x206   : > { %s1125_s11 = smov 128   ;;  %s1126_s8 = smov 8  }
 0x207   : > { %820 = dma.vmem_to_hbm [thread:$0]  (%p1203_p11), %s595_s25, 256, %s597_s26, %s565_s10, %s1125_s11, %s1125_s11, %s1126_s8  }
 0x208   : > { %s371_s13 = scalar_lea.vmem [#allocation10], %s1320_s0  ;;  %s576_s24 = scalar_lea.hbm %s1418_s4, %s809_s23 }
 0x209   : > { %s577_s28 = sshll.u32 %s371_s13, 4  ;;  %s579_s1 = sshll.u32 %s576_s24, 4  ;;  %s578_s28 = int_to_ptr.vmem [resolvable:$true] %s577_s28  ;;  %s580_s1 = int_to_ptr.hbm [resolvable:$true] %s579_s1 }
 0x20a   : > { %s560_s27 = scalar_lea.sflag [#allocation4], %s1317_s14  ;;  %s1054_s17 = sshra.s32 %s580_s1, 4  ;;  %s1055_s17 = int_to_ptr.hbm [resolvable:$true] %s1054_s17 }
 0x20b   : > { %s1056_s25 = scalar_lea.hbm %s1055_s17, 16  ;;  %s1060_s10 = scalar_lea.hbm %s1418_s4, 32 }
 0x20c   : > { %p1057_p0 = scmp.ne.s32.totalorder %s1055_s17, %s1056_s25  ;;  %p1061_p1 = scmp.lt.s32.totalorder %s1055_s17, %s1418_s4 }
 0x20d   : > { %p1062_p6 = scmp.lt.s32.totalorder %s1060_s10, %s1056_s25 }
 0x20e   : > { %p1058_p8 = pnand %p1057_p0, %p1203_p11 }
 0x20f   : > { %p1063_p13 = por %p1062_p6, %p1061_p1 }
 0x210   : > { %p1059_p10 = pneg %p1058_p8 }
 0x212   : > { %p1064_p2 = pnand %p1063_p13, %p1059_p10 }
 0x27f   : > { %v529_v55 = vpop.f32.mrf.mxu2 }
 0x280   : > { %555 = vst.msk [vmem:[%s371_s13] sm:$0xff] %vm397_vm0, %v529_v55 }
 0x287   : > { %v552_v56 = vpop.f32.mrf.mxu3 }
 0x288   : > { %556 = vst.msk [vmem:[%s371_s13 + $0x8] sm:$0xff] %vm397_vm0, %v552_v56 }
 0x289   : > { %1067 = shalt.err (!%p1064_p2)
}
 0x28a   : > { %819 = dma.vmem_to_hbm [thread:$0]  (%p1203_p11), %s578_s28, 256, %s580_s1, %s560_s27, %s1125_s11, %s1125_s11, %s1126_s8  }
 0x28b PF: > { %s611_s6 = sand.u32 1, %s1106_s18   ;;  %p837_p3 = pnand %p771_p9, %p1207_p12 }
 0x28c   : > { %s612_s12 = scalar_lea.sflag [#allocation4], %s611_s6 }
 0x28d   : > { %p838_p4 = pneg %p837_p3 }
 0x28f   : > { %1097 = dma.done.wait (%p838_p4), %s612_s12, 256  }
 0x290   : > { %1099 = vsyncadd (%p838_p4), %s612_s12, 4294967040  ;;  %s622_s30 = scalar_lea.sflag [#allocation12], %s611_s6 }
 0x291   : > { %1101 = dma.done.wait (%p838_p4), %s622_s30, 256  }
 0x292   : > { %1103 = vsyncadd (%p838_p4), %s622_s30, 4294967040  ;;  %s1441_s21 = sld [smem:[#allocation19_spill]]  ;;  %s1444_s18 = smov %s1110_s19 }
 0x293   : > { %s1442_s29 = sld [smem:[#allocation18_spill]] }
 0x294   : > { %s1443_s20 = sld [smem:[#allocation20_spill]] }
 0x298   : > { %p28_p11 = scmp.ge.s32.totalorder %s1441_s21, 4  }
 0x299   : > { %s1445_s19 = smov %s1442_s29 }
 0x29a   :  { %30 = sbr.rel (!%p28_p11) target bundleno = 14 (0xe), region = 135 }
 0x29f   :  { %628 = vsyncpa [#allocation3], 1 }
 0x2a0   :  { %630 = vsyncpa [#allocation3 + $0x1], 1 }
 0x2a1   :  { %631 = vsyncpa [#allocation6], 1 }
 0x2a2   :  { %633 = vsyncpa [#allocation6 + $0x1], 1 }
 0x2a3   :  { %634 = vsyncpa [#allocation9], 1 }
 0x2a4   :  { %636 = vsyncpa [#allocation9 + $0x1], 1 }
 0x2a5   :  { %637 = vsyncpa [#allocation4], 1 }
 0x2a6   :  { %639 = vsyncpa [#allocation4 + $0x1], 1 }
 0x2a7   :  { %640 = vsyncpa [#allocation12], 1 }
 0x2a8   :  { %642 = vsyncpa [#allocation12 + $0x1], 1 }

</bundles_post_ra>
